<compile_context>
chip_gen: v6e
topology: v6e:2x2x1
jax: 0.10.0
libtpu: 0.0.40
codegen_flags: <defaults>
</compile_context>

<pallas_src>
import functools

import numpy as np
import jax
import jax.numpy as jnp
from jax.experimental import pallas as pl
from jax.experimental.pallas import tpu as pltpu

# ---------------- config (matches the PyTorch module's __init__ contract) ----
WORD_VEC_SIZE = 32           # config['word_vec_size']
KERNEL_SIZES = (3, 4, 5)     # config['kernel_sizes'] = '3,4,5'
MEM_SIZE = 48                # config['mem_size'] (divisible by len(kernel_sizes))
HID_SIZE_CLS = 32            # config['hid_sizes_cls'] = '32'
NUM_TOKENS = 100
NUM_CLASSES = 5
PAD_ID = 0
C_PER_BRANCH = MEM_SIZE // len(KERNEL_SIZES)   # 16
KMAX = max(KERNEL_SIZES)                       # 5

_VMEM = pl.BlockSpec(memory_space=pltpu.MemorySpace.VMEM)


# ---------------- single fused Pallas kernel ---------------------------------
def fused_forward_kernel(tok_ref, lut_ref, wc_ref, bc_ref, lout_ref,
                         w1_ref, b1_ref, w2_ref, b2_ref, out_ref,
                         *, batch, seq_len):
    """Fused RepModel forward.

    tok_ref : (B*L, 1) int32         token ids (already padded to L >= k_max)
    lut_ref : (Vpad, D) f32          embedding table (vocab padded to 128 rows)
    wc_ref  : (KMAX, D, C) f32       merged conv weights (zero-padded taps)
    bc_ref  : (1, C) f32             merged conv biases
    lout_ref: (1, C) int32           per-channel valid output length L - k + 1
    w1/b1, w2/b2                     classifier params
    out_ref : (B, num_classes) f32   log-probabilities
    """
    BL = batch * seq_len
    Vp = lut_ref.shape[0]
    C = wc_ref.shape[2]

    # ---- embedding lookup: one-hot @ LUT on the MXU (replaces XLA gather) ----
    tok = tok_ref[...]                                              # (BL, 1)
    vocab_iota = jax.lax.broadcasted_iota(jnp.int32, (BL, Vp), 1)
    onehot = (vocab_iota == tok).astype(jnp.float32)                # (BL, Vp)
    x = jnp.dot(onehot, lut_ref[...],
                preferred_element_type=jnp.float32)                 # (BL, D)

    # ---- merged conv branches: KMAX shared shifted matmuls -------------------
    # acc[t, c] = sum_i x[t + i] @ Wc[i, :, c]   (Wc tap i is zero for i >= k_c)
    # The shift is an exact 0/1 matrix applied on the MXU: no unaligned slices.
    row = jax.lax.broadcasted_iota(jnp.int32, (BL, BL), 0)
    col = jax.lax.broadcasted_iota(jnp.int32, (BL, BL), 1)
    delta = col - row                                               # s - t
    acc = jnp.zeros((BL, C), jnp.float32)
    for i in range(KMAX):                                           # static unroll (5)
        y = jnp.dot(x, wc_ref[i], preferred_element_type=jnp.float32)   # (BL, C)
        if i > 0:
            shift_m = (delta == i).astype(jnp.float32)              # (BL, BL)
            y = jnp.dot(shift_m, y, preferred_element_type=jnp.float32)  # y[t] = y_old[t+i]
        acc = acc + y
    acc = jnp.maximum(acc + bc_ref[...], 0.0)                       # bias once + ReLU

    # ---- per-branch valid-length mask + per-batch max-pool over time ---------
    acc3 = acc.reshape(batch, seq_len, C)
    t_iota = jax.lax.broadcasted_iota(jnp.int32, (batch, seq_len, C), 1)
    valid = t_iota < lout_ref[...].reshape(1, 1, C)
    # ReLU output >= 0 and every branch has >= 1 valid position, so filling
    # invalid positions with 0 preserves the max over the valid window.
    rep = jnp.max(jnp.where(valid, acc3, 0.0), axis=1)              # (B, C) == mem_size

    # ---- classifier: tanh(Linear) -> Linear -> LogSoftmax ---------------------
    h = jnp.tanh(jnp.dot(rep, w1_ref[...],
                         preferred_element_type=jnp.float32) + b1_ref[...])
    logits = jnp.dot(h, w2_ref[...],
                     preferred_element_type=jnp.float32) + b2_ref[...]
    z = logits - jnp.max(logits, axis=-1, keepdims=True)
    out_ref[...] = z - jnp.log(jnp.sum(jnp.exp(z), axis=-1, keepdims=True))


# ---------------- wrappers ----------------------------------------------------
def prepare_params(params):
    """One-time repacking of per-branch params into the fused-kernel layout."""
    vpad = ((NUM_TOKENS + 127) // 128) * 128
    lut = jnp.pad(params["word_lut"], ((0, vpad - NUM_TOKENS), (0, 0)))
    w_cat, b_cat = [], []
    for k in KERNEL_SIZES:
        w = params[f"conv{k}_w"]                                    # (k, D, C_b)
        w_cat.append(jnp.pad(w, ((0, KMAX - k), (0, 0), (0, 0))))   # zero taps i >= k
        b_cat.append(params[f"conv{k}_b"])
    return {
        "word_lut_pad": lut,                                        # (Vpad, D)
        "w_conv": jnp.concatenate(w_cat, axis=2),                   # (KMAX, D, 48)
        "b_conv": jnp.concatenate(b_cat, axis=1),                   # (1, 48)
        "fc1_w": params["fc1_w"], "fc1_b": params["fc1_b"],
        "fc2_w": params["fc2_w"], "fc2_b": params["fc2_b"],
    }


@jax.jit
def _fused_forward(packed, tokens):
    B, L = tokens.shape
    if KMAX > L:   # pad with PAD tokens (embedding row is zero), like the torch code
        tokens = jnp.pad(tokens, ((0, 0), (0, KMAX - L)), constant_values=PAD_ID)
    L_pad = tokens.shape[1]
    tok2d = tokens.reshape(B * L_pad, 1).astype(jnp.int32)
    lout = jnp.asarray(np.concatenate(
        [np.full((C_PER_BRANCH,), L_pad - k + 1, dtype=np.int32)
         for k in KERNEL_SIZES]).reshape(1, MEM_SIZE))

    kernel = functools.partial(fused_forward_kernel, batch=B, seq_len=L_pad)
    return pl.pallas_call(
        kernel,
        out_shape=jax.ShapeDtypeStruct((B, NUM_CLASSES), jnp.float32),
        in_specs=[_VMEM] * 9,
        out_specs=_VMEM,
    )(tok2d, packed["word_lut_pad"], packed["w_conv"], packed["b_conv"], lout,
      packed["fc1_w"], packed["fc1_b"], packed["fc2_w"], packed["fc2_b"])


def rep_model_forward(packed, tokens, length=None):
    """RepModel.forward: (tokens, length) -> (log-probs, extra_out).

    `length` is unused on purpose: the PyTorch CNN encoder also ignores it
    (it convolves over PAD positions, whose embeddings are zero via padding_idx).
    Dropout is identity in eval mode.
    """
    return _fused_forward(packed, tokens), None


# ---------------- pure-JAX reference (for correctness check) ------------------
def reference_forward(params, tokens):
    P = jax.lax.Precision.HIGHEST
    emb = jnp.take(params["word_lut"], tokens, axis=0)              # (B, L, D)
    B, L, _ = emb.shape
    if KMAX > L:
        emb = jnp.pad(emb, ((0, 0), (0, KMAX - L), (0, 0)))
        L = emb.shape[1]
    branch = []
    for k in KERNEL_SIZES:
        w, b = params[f"conv{k}_w"], params[f"conv{k}_b"]
        l_out = L - k + 1
        acc = jnp.zeros((B, l_out, C_PER_BRANCH), jnp.float32) + b[None]
        for i in range(k):
            acc = acc + jnp.einsum("btd,dc->btc", emb[:, i:i + l_out, :], w[i],
                                   precision=P)
        branch.append(jnp.max(jnp.maximum(acc, 0.0), axis=1))
    rep = jnp.concatenate(branch, axis=1)
    h = jnp.tanh(jnp.dot(rep, params["fc1_w"], precision=P) + params["fc1_b"])
    logits = jnp.dot(h, params["fc2_w"], precision=P) + params["fc2_b"]
    return jax.nn.log_softmax(logits, axis=-1)


# ---------------- deterministic parameter init --------------------------------
def init_params(key):
    keys = jax.random.split(key, 4 + 2 * len(KERNEL_SIZES))
    params = {}
    emb = 0.1 * jax.random.normal(keys[0], (NUM_TOKENS, WORD_VEC_SIZE), jnp.float32)
    emb = emb.at[PAD_ID].set(0.0)                                   # padding_idx row = 0
    params["word_lut"] = emb

    for idx, k in enumerate(KERNEL_SIZES):
        fan_in = k * WORD_VEC_SIZE
        scale = 1.0 / jnp.sqrt(fan_in)
        params[f"conv{k}_w"] = scale * jax.random.normal(
            keys[1 + 2 * idx], (k, WORD_VEC_SIZE, C_PER_BRANCH), jnp.float32)
        params[f"conv{k}_b"] = scale * jax.random.normal(
            keys[2 + 2 * idx], (1, C_PER_BRANCH), jnp.float32)

    k1, k2, k3 = keys[-3], keys[-2], keys[-1]
    params["fc1_w"] = (1.0 / jnp.sqrt(MEM_SIZE)) * jax.random.normal(
        k1, (MEM_SIZE, HID_SIZE_CLS), jnp.float32)
    params["fc1_b"] = jnp.zeros((1, HID_SIZE_CLS), jnp.float32)
    params["fc2_w"] = (1.0 / jnp.sqrt(HID_SIZE_CLS)) * jax.random.normal(
        k2, (HID_SIZE_CLS, NUM_CLASSES), jnp.float32)
    params["fc2_b"] = 0.01 * jax.random.normal(k3, (1, NUM_CLASSES), jnp.float32)
    return params


# ---------------- main ---------------------------------------------------------
if __name__ == "__main__":
    key = jax.random.PRNGKey(0)
    params = init_params(key)
    packed = prepare_params(params)

    B, L = 2, 16
    tok_key = jax.random.fold_in(key, 123)
    tokens = jax.random.randint(tok_key, (B, L), 1, NUM_TOKENS, dtype=jnp.int32)
    # emulate padding on the second sequence
    lengths = [16, 12]
    tokens = tokens.at[1, lengths[1]:].set(PAD_ID)

    log_probs, extra = rep_model_forward(packed, tokens, lengths)
    log_probs = jax.block_until_ready(log_probs)

    assert log_probs.shape == (B, NUM_CLASSES)
    assert bool(jnp.all(jnp.isfinite(log_probs)))
    # rows of log_softmax should (exp-)sum to ~1
    assert bool(jnp.allclose(jnp.sum(jnp.exp(log_probs), axis=-1), 1.0, atol=1e-4))
    # match the pure-JAX reference of the same model
    ref = reference_forward(params, tokens)
    assert bool(jnp.allclose(log_probs, ref, atol=2e-3, rtol=2e-3))
    print("KERNEL_OK")
</pallas_src>

<mosaic_0001>
module attributes {stable_mosaic.version = 11 : i64} {
  func.func @fused_forward_kernel(%arg0: memref<32x1xi32, #tpu.memory_space<vmem>>, %arg1: memref<128x32xf32, #tpu.memory_space<vmem>>, %arg2: memref<5x32x48xf32, #tpu.memory_space<vmem>>, %arg3: memref<1x48xf32, #tpu.memory_space<vmem>>, %arg4: memref<1x48xi32, #tpu.memory_space<vmem>>, %arg5: memref<48x32xf32, #tpu.memory_space<vmem>>, %arg6: memref<1x32xf32, #tpu.memory_space<vmem>>, %arg7: memref<32x5xf32, #tpu.memory_space<vmem>>, %arg8: memref<1x5xf32, #tpu.memory_space<vmem>>, %arg9: memref<2x5xf32, #tpu.memory_space<vmem>>) attributes {dimension_semantics = [], scalar_prefetch = 0 : i64, scratch_operands = 0 : i64, tpu.core_type = #tpu.core_type<tc>} {
    %c0 = arith.constant 0 : index
    %c0_0 = arith.constant 0 : index
    %0 = vector.load %arg0[%c0, %c0_0] : memref<32x1xi32, #tpu.memory_space<vmem>>, vector<32x1xi32>
    %1 = tpu.iota {dimensions = array<i32: 1>} : vector<32x128xi32>
    %2 = vector.broadcast %0 : vector<32x1xi32> to vector<32x128xi32>
    %3 = arith.cmpi eq, %1, %2 : vector<32x128xi32>
    %4 = arith.extui %3 : vector<32x128xi1> to vector<32x128xi32>
    %5 = arith.sitofp %4 : vector<32x128xi32> to vector<32x128xf32>
    %c0_1 = arith.constant 0 : index
    %c0_2 = arith.constant 0 : index
    %6 = vector.load %arg1[%c0_1, %c0_2] : memref<128x32xf32, #tpu.memory_space<vmem>>, vector<128x32xf32>
    %cst = arith.constant dense<0.000000e+00> : vector<32x32xf32>
    %7 = tpu.matmul %5, %6, %cst {dimension_numbers = #tpu.dot_dimension_numbers<[1], [0], [0], [1], [0, 0, 1, 1], [], []>} : vector<32x128xf32>, vector<128x32xf32>, vector<32x32xf32> -> vector<32x32xf32>
    %8 = tpu.iota {dimensions = array<i32: 0>} : vector<32x32xi32>
    %9 = tpu.iota {dimensions = array<i32: 1>} : vector<32x32xi32>
    %10 = arith.subi %9, %8 : vector<32x32xi32>
    %cst_3 = arith.constant 0.000000e+00 : f32
    %11 = vector.broadcast %cst_3 : f32 to vector<32x48xf32>
    %c0_4 = arith.constant 0 : index
    %c0_5 = arith.constant 0 : index
    %c0_6 = arith.constant 0 : index
    %12 = vector.load %arg2[%c0_4, %c0_5, %c0_6] : memref<5x32x48xf32, #tpu.memory_space<vmem>>, vector<1x32x48xf32>
    %13 = vector.shape_cast %12 : vector<1x32x48xf32> to vector<32x48xf32>
    %cst_7 = arith.constant dense<0.000000e+00> : vector<32x48xf32>
    %14 = tpu.matmul %7, %13, %cst_7 {dimension_numbers = #tpu.dot_dimension_numbers<[1], [0], [0], [1], [0, 0, 1, 1], [], []>} : vector<32x32xf32>, vector<32x48xf32>, vector<32x48xf32> -> vector<32x48xf32>
    %15 = arith.addf %11, %14 : vector<32x48xf32>
    %c1 = arith.constant 1 : index
    %c0_8 = arith.constant 0 : index
    %c0_9 = arith.constant 0 : index
    %16 = vector.load %arg2[%c1, %c0_8, %c0_9] : memref<5x32x48xf32, #tpu.memory_space<vmem>>, vector<1x32x48xf32>
    %17 = vector.shape_cast %16 : vector<1x32x48xf32> to vector<32x48xf32>
    %cst_10 = arith.constant dense<0.000000e+00> : vector<32x48xf32>
    %18 = tpu.matmul %7, %17, %cst_10 {dimension_numbers = #tpu.dot_dimension_numbers<[1], [0], [0], [1], [0, 0, 1, 1], [], []>} : vector<32x32xf32>, vector<32x48xf32>, vector<32x48xf32> -> vector<32x48xf32>
    %c1_i32 = arith.constant 1 : i32
    %19 = vector.broadcast %c1_i32 : i32 to vector<32x32xi32>
    %20 = arith.cmpi eq, %10, %19 : vector<32x32xi32>
    %21 = arith.extui %20 : vector<32x32xi1> to vector<32x32xi32>
    %22 = arith.sitofp %21 : vector<32x32xi32> to vector<32x32xf32>
    %cst_11 = arith.constant dense<0.000000e+00> : vector<32x48xf32>
    %23 = tpu.matmul %22, %18, %cst_11 {dimension_numbers = #tpu.dot_dimension_numbers<[1], [0], [0], [1], [0, 0, 1, 1], [], []>} : vector<32x32xf32>, vector<32x48xf32>, vector<32x48xf32> -> vector<32x48xf32>
    %24 = arith.addf %15, %23 : vector<32x48xf32>
    %c2 = arith.constant 2 : index
    %c0_12 = arith.constant 0 : index
    %c0_13 = arith.constant 0 : index
    %25 = vector.load %arg2[%c2, %c0_12, %c0_13] : memref<5x32x48xf32, #tpu.memory_space<vmem>>, vector<1x32x48xf32>
    %26 = vector.shape_cast %25 : vector<1x32x48xf32> to vector<32x48xf32>
    %cst_14 = arith.constant dense<0.000000e+00> : vector<32x48xf32>
    %27 = tpu.matmul %7, %26, %cst_14 {dimension_numbers = #tpu.dot_dimension_numbers<[1], [0], [0], [1], [0, 0, 1, 1], [], []>} : vector<32x32xf32>, vector<32x48xf32>, vector<32x48xf32> -> vector<32x48xf32>
    %c2_i32 = arith.constant 2 : i32
    %28 = vector.broadcast %c2_i32 : i32 to vector<32x32xi32>
    %29 = arith.cmpi eq, %10, %28 : vector<32x32xi32>
    %30 = arith.extui %29 : vector<32x32xi1> to vector<32x32xi32>
    %31 = arith.sitofp %30 : vector<32x32xi32> to vector<32x32xf32>
    %cst_15 = arith.constant dense<0.000000e+00> : vector<32x48xf32>
    %32 = tpu.matmul %31, %27, %cst_15 {dimension_numbers = #tpu.dot_dimension_numbers<[1], [0], [0], [1], [0, 0, 1, 1], [], []>} : vector<32x32xf32>, vector<32x48xf32>, vector<32x48xf32> -> vector<32x48xf32>
    %33 = arith.addf %24, %32 : vector<32x48xf32>
    %c3 = arith.constant 3 : index
    %c0_16 = arith.constant 0 : index
    %c0_17 = arith.constant 0 : index
    %34 = vector.load %arg2[%c3, %c0_16, %c0_17] : memref<5x32x48xf32, #tpu.memory_space<vmem>>, vector<1x32x48xf32>
    %35 = vector.shape_cast %34 : vector<1x32x48xf32> to vector<32x48xf32>
    %cst_18 = arith.constant dense<0.000000e+00> : vector<32x48xf32>
    %36 = tpu.matmul %7, %35, %cst_18 {dimension_numbers = #tpu.dot_dimension_numbers<[1], [0], [0], [1], [0, 0, 1, 1], [], []>} : vector<32x32xf32>, vector<32x48xf32>, vector<32x48xf32> -> vector<32x48xf32>
    %c3_i32 = arith.constant 3 : i32
    %37 = vector.broadcast %c3_i32 : i32 to vector<32x32xi32>
    %38 = arith.cmpi eq, %10, %37 : vector<32x32xi32>
    %39 = arith.extui %38 : vector<32x32xi1> to vector<32x32xi32>
    %40 = arith.sitofp %39 : vector<32x32xi32> to vector<32x32xf32>
    %cst_19 = arith.constant dense<0.000000e+00> : vector<32x48xf32>
    %41 = tpu.matmul %40, %36, %cst_19 {dimension_numbers = #tpu.dot_dimension_numbers<[1], [0], [0], [1], [0, 0, 1, 1], [], []>} : vector<32x32xf32>, vector<32x48xf32>, vector<32x48xf32> -> vector<32x48xf32>
    %42 = arith.addf %33, %41 : vector<32x48xf32>
    %c4 = arith.constant 4 : index
    %c0_20 = arith.constant 0 : index
    %c0_21 = arith.constant 0 : index
    %43 = vector.load %arg2[%c4, %c0_20, %c0_21] : memref<5x32x48xf32, #tpu.memory_space<vmem>>, vector<1x32x48xf32>
    %44 = vector.shape_cast %43 : vector<1x32x48xf32> to vector<32x48xf32>
    %cst_22 = arith.constant dense<0.000000e+00> : vector<32x48xf32>
    %45 = tpu.matmul %7, %44, %cst_22 {dimension_numbers = #tpu.dot_dimension_numbers<[1], [0], [0], [1], [0, 0, 1, 1], [], []>} : vector<32x32xf32>, vector<32x48xf32>, vector<32x48xf32> -> vector<32x48xf32>
    %c4_i32 = arith.constant 4 : i32
    %46 = vector.broadcast %c4_i32 : i32 to vector<32x32xi32>
    %47 = arith.cmpi eq, %10, %46 : vector<32x32xi32>
    %48 = arith.extui %47 : vector<32x32xi1> to vector<32x32xi32>
    %49 = arith.sitofp %48 : vector<32x32xi32> to vector<32x32xf32>
    %cst_23 = arith.constant dense<0.000000e+00> : vector<32x48xf32>
    %50 = tpu.matmul %49, %45, %cst_23 {dimension_numbers = #tpu.dot_dimension_numbers<[1], [0], [0], [1], [0, 0, 1, 1], [], []>} : vector<32x32xf32>, vector<32x48xf32>, vector<32x48xf32> -> vector<32x48xf32>
    %51 = arith.addf %42, %50 : vector<32x48xf32>
    %c0_24 = arith.constant 0 : index
    %c0_25 = arith.constant 0 : index
    %52 = vector.load %arg3[%c0_24, %c0_25] : memref<1x48xf32, #tpu.memory_space<vmem>>, vector<1x48xf32>
    %53 = vector.broadcast %52 : vector<1x48xf32> to vector<32x48xf32>
    %54 = arith.addf %51, %53 : vector<32x48xf32>
    %cst_26 = arith.constant 0.000000e+00 : f32
    %55 = vector.broadcast %cst_26 : f32 to vector<32x48xf32>
    %56 = arith.maximumf %54, %55 : vector<32x48xf32>
    %57 = vector.shape_cast %56 : vector<32x48xf32> to vector<2x16x48xf32>
    %58 = tpu.iota {dimensions = array<i32: 1>} : vector<2x16x48xi32>
    %c0_27 = arith.constant 0 : index
    %c0_28 = arith.constant 0 : index
    %59 = vector.load %arg4[%c0_27, %c0_28] : memref<1x48xi32, #tpu.memory_space<vmem>>, vector<1x48xi32>
    %60 = vector.shape_cast %59 : vector<1x48xi32> to vector<1x1x48xi32>
    %61 = vector.broadcast %60 : vector<1x1x48xi32> to vector<2x16x48xi32>
    %62 = arith.cmpi slt, %58, %61 : vector<2x16x48xi32>
    %cst_29 = arith.constant 0.000000e+00 : f32
    %63 = vector.broadcast %cst_29 : f32 to vector<2x16x48xf32>
    %64 = arith.select %62, %57, %63 : vector<2x16x48xi1>, vector<2x16x48xf32>
    %cst_30 = arith.constant dense<0xFF800000> : vector<2x48xf32>
    %65 = vector.multi_reduction <maximumf>, %64, %cst_30 [1] : vector<2x16x48xf32> to vector<2x48xf32>
    %c0_31 = arith.constant 0 : index
    %c0_32 = arith.constant 0 : index
    %66 = vector.load %arg5[%c0_31, %c0_32] : memref<48x32xf32, #tpu.memory_space<vmem>>, vector<48x32xf32>
    %cst_33 = arith.constant dense<0.000000e+00> : vector<2x32xf32>
    %67 = tpu.matmul %65, %66, %cst_33 {dimension_numbers = #tpu.dot_dimension_numbers<[1], [0], [0], [1], [0, 0, 1, 1], [], []>} : vector<2x48xf32>, vector<48x32xf32>, vector<2x32xf32> -> vector<2x32xf32>
    %c0_34 = arith.constant 0 : index
    %c0_35 = arith.constant 0 : index
    %68 = vector.load %arg6[%c0_34, %c0_35] : memref<1x32xf32, #tpu.memory_space<vmem>>, vector<1x32xf32>
    %69 = vector.broadcast %68 : vector<1x32xf32> to vector<2x32xf32>
    %70 = arith.addf %67, %69 : vector<2x32xf32>
    %71 = math.tanh %70 : vector<2x32xf32>
    %c0_36 = arith.constant 0 : index
    %c0_37 = arith.constant 0 : index
    %72 = vector.load %arg7[%c0_36, %c0_37] : memref<32x5xf32, #tpu.memory_space<vmem>>, vector<32x5xf32>
    %cst_38 = arith.constant dense<0.000000e+00> : vector<2x5xf32>
    %73 = tpu.matmul %71, %72, %cst_38 {dimension_numbers = #tpu.dot_dimension_numbers<[1], [0], [0], [1], [0, 0, 1, 1], [], []>} : vector<2x32xf32>, vector<32x5xf32>, vector<2x5xf32> -> vector<2x5xf32>
    %c0_39 = arith.constant 0 : index
    %c0_40 = arith.constant 0 : index
    %74 = vector.load %arg8[%c0_39, %c0_40] : memref<1x5xf32, #tpu.memory_space<vmem>>, vector<1x5xf32>
    %75 = vector.broadcast %74 : vector<1x5xf32> to vector<2x5xf32>
    %76 = arith.addf %73, %75 : vector<2x5xf32>
    %cst_41 = arith.constant dense<0xFF800000> : vector<2xf32>
    %77 = vector.multi_reduction <maximumf>, %76, %cst_41 [1] : vector<2x5xf32> to vector<2xf32>
    %78 = vector.shape_cast %77 : vector<2xf32> to vector<2x1xf32>
    %79 = vector.broadcast %78 : vector<2x1xf32> to vector<2x5xf32>
    %80 = arith.subf %76, %79 : vector<2x5xf32>
    %81 = math.exp %80 : vector<2x5xf32>
    %cst_42 = arith.constant dense<0.000000e+00> : vector<2xf32>
    %82 = vector.multi_reduction <add>, %81, %cst_42 [1] : vector<2x5xf32> to vector<2xf32>
    %83 = vector.shape_cast %82 : vector<2xf32> to vector<2x1xf32>
    %84 = math.log %83 : vector<2x1xf32>
    %85 = vector.broadcast %84 : vector<2x1xf32> to vector<2x5xf32>
    %86 = arith.subf %80, %85 : vector<2x5xf32>
    %c0_43 = arith.constant 0 : index
    %c0_44 = arith.constant 0 : index
    %87 = vector.load %arg9[%c0_43, %c0_44] : memref<2x5xf32, #tpu.memory_space<vmem>>, vector<2x5xf32>
    tpu.vector_store %arg9[%c0_43, %c0_44], %86 {strides = array<i32>} : memref<2x5xf32, #tpu.memory_space<vmem>>, vector<2x5xf32>,
    return
  }
}

</mosaic_0001>

<bundles_post_ra>
// kernel: _fused_forward.1
= control target key start
LH: loop header
LB: loop body
LE: loop exit
PB: predicated region body
PF: predicated region fallthrough
CT: control target
= control target key end

     0   :  { %v1741_v2 = vmov 0   ;;  %s2113_s0 = inlined_call_operand.vmem [shape: s32[32,1], index: 0, kind: input, shape index: {}]   ;;  %s2114_s1 = inlined_call_operand.vmem [shape: f32[128,32], index: 1, kind: input, shape index: {}]   ;;  %s2115_s2 = inlined_call_operand.vmem [shape: f32[5,32,48], index: 2, kind: input, shape index: {}]   ;;  %s2116_s3 = inlined_call_operand.vmem [shape: f32[1,48], index: 3, kind: input, shape index: {}]   ;;  %s2117_s4 = inlined_call_operand.vmem [shape: s32[1,48], index: 4, kind: input, shape index: {}]   ;;  %s2118_s5 = inlined_call_operand.vmem [shape: f32[48,32], index: 5, kind: input, shape index: {}]   ;;  %s2119_s6 = inlined_call_operand.vmem [shape: f32[1,32], index: 6, kind: input, shape index: {}]   ;;  %s2120_s7 = inlined_call_operand.vmem [shape: f32[32,5], index: 7, kind: input, shape index: {}]   ;;  %s2121_s8 = inlined_call_operand.vmem [shape: f32[1,5], index: 8, kind: input, shape index: {}]   ;;  %s2122_s9 = inlined_call_operand.hbm [shape: f32[2,5], index: 9, kind: output, shape index: {}]  }
   0x1   :  { %v35_v0 = vld [vmem:[%s2113_s0 + $0x10] sm:$0xff]  ;;  %v33_v1 = vld [vmem:[%s2113_s0] sm:$0xff]  ;;  %1712 = vset.pattern.permute.xlu1 %v1741_v2  ;;  %1711 = vset.pattern.permute.xlu0 %v1741_v2  ;;  %v78_v3 = vld [vmem:[%s2114_s1 + $0x78] sm:$0xff] }
   0x2   :  { %46 = vperm.xlu1 %1712, %v35_v0   ;;  %40 = vperm.xlu0 %1711, %v33_v1   ;;  %v77_v4 = vld [vmem:[%s2114_s1 + $0x70] sm:$0xff]  ;;  %v36_v5 = vld [vmem:[%s2113_s0 + $0x18] sm:$0xff]  ;;  %v34_v6 = vld [vmem:[%s2113_s0 + $0x8] sm:$0xff] }
   0x3   :  { %1516 = vmatprep.subr.mxu0 %v78_v3  ;;  %v76_v7 = vld [vmem:[%s2114_s1 + $0x68] sm:$0xff] }
   0x4   :  { %1517 = vmatpush3.msra.mxu0 %v78_v3 }
   0x5   :  { %1518 = vmatprep.subr.mxu0 %v77_v4 }
   0x6   :  { %49 = vperm.xlu1 %1712, %v36_v5   ;;  %43 = vperm.xlu0 %1711, %v34_v6  }
   0x7   :  { %14 = vsyncpa [#allocation3], 0  ;;  %1519 = vmatpush3.msra.mxu0 %v77_v4  ;;  %v75_v8 = vld [vmem:[%s2114_s1 + $0x60] sm:$0xff]  ;;  %v1341_v9 = vld [vmem:[%s2115_s2 + $0x38] sm:$0xff]  ;;  %v37_v23 = vlaneseq  ;;  %v1742_v27 = vmov 1.0   ;;  %vm182_vm4 = vcmask 261120  }
   0x8   :  { %v1340_v10 = vld [vmem:[%s2115_s2 + $0x30] sm:$0xff]  ;;  %1520 = vmatprep.subr.mxu0 %v76_v7  ;;  %1554 = vmatprep.subr.mxu1 %v1341_v9  ;;  %v74_v11 = vld [vmem:[%s2114_s1 + $0x58] sm:$0xff]  ;;  %v72_v13 = vld [vmem:[%s2114_s1 + $0x48] sm:$0xff]  ;;  %v1743_v38 = vmov 0.0  }
   0x9   :  { %1521 = vmatpush3.msra.mxu0 %v76_v7  ;;  %1555 = vmatpush3.msra.mxu1 %v1341_v9  ;;  %v73_v12 = vld [vmem:[%s2114_s1 + $0x50] sm:$0xff]  ;;  %v71_v14 = vld [vmem:[%s2114_s1 + $0x40] sm:$0xff]  ;;  %v70_v15 = vld [vmem:[%s2114_s1 + $0x38] sm:$0xff]  ;;  %v38_v24 = vand.u32 127, %v37_v23  ;;  %v1884_v36 = vshrl.u32 %v37_v23, 7 }
   0xa   :  { %1522 = vmatprep.subr.mxu0 %v75_v8  ;;  %1556 = vmatprep.subr.mxu1 %v1340_v10  ;;  %v69_v16 = vld [vmem:[%s2114_s1 + $0x30] sm:$0xff]  ;;  %v68_v17 = vld [vmem:[%s2114_s1 + $0x28] sm:$0xff]  ;;  %v67_v18 = vld [vmem:[%s2114_s1 + $0x20] sm:$0xff] }
   0xb   :  { %1523 = vmatpush3.msra.mxu0 %v75_v8  ;;  %1557 = vmatpush3.msra.mxu1 %v1340_v10  ;;  %v66_v19 = vld [vmem:[%s2114_s1 + $0x18] sm:$0xff]  ;;  %v65_v20 = vld [vmem:[%s2114_s1 + $0x10] sm:$0xff]  ;;  %v64_v21 = vld [vmem:[%s2114_s1 + $0x8] sm:$0xff]  ;;  %v1887_v37 = vsub.s32 %v38_v24, %v1884_v36  ;;  %v1893_v40 = vadd.s32 8, %v1884_v36  ;;  %v167_v42 = vadd.s32 16, %v1884_v36  ;;  %v168_v45 = vadd.s32 24, %v1884_v36 }
   0xc   :  { %1524 = vmatprep.subr.mxu0 %v74_v11  ;;  %v63_v22 = vld [vmem:[%s2114_s1] sm:$0xff]  ;;  %v1339_v30 = vld [vmem:[%s2115_s2 + $0x28] sm:$0xff]  ;;  %v176_v51 = vld [vmem:[%s2115_s2 + $0x18] sm:$0xff] }
   0xd   :  { %1525 = vmatpush3.msra.mxu0 %v74_v11  ;;  %1558 = vmatprep.subr.mxu1 %v1339_v30  ;;  %v1338_v31 = vld [vmem:[%s2115_s2 + $0x20] sm:$0xff]  ;;  %vm280_vm5 = vcmp.eq.s32.totalorder %v1887_v37, 1  ;;  %v1897_v44 = vsub.s32 %v38_v24, %v1893_v40  ;;  %v1900_v47 = vsub.s32 %v38_v24, %v167_v42  ;;  %v1903_v49 = vsub.s32 %v38_v24, %v168_v45  ;;  %v175_v53 = vld [vmem:[%s2115_s2 + $0x10] sm:$0xff]  ;;  %v174_v55 = vld [vmem:[%s2115_s2 + $0x8] sm:$0xff] }
   0xe   :  { %1526 = vmatprep.subr.mxu0 %v73_v12  ;;  %1559 = vmatpush3.msra.mxu1 %v1339_v30  ;;  %v1346_v39 = vsel %vm280_vm5, 1.0, %v1743_v38  ;;  %v173_v56 = vld [vmem:[%s2115_s2] sm:$0xff]  ;;  %v1361_v57 = vld [vmem:[%s2115_s2 + $0x58] sm:$0xff]  ;;  %v1360_v58 = vld [vmem:[%s2115_s2 + $0x50] sm:$0xff]  ;;  %vm564_vm9 = vcmp.eq.s32.totalorder %v1887_v37, 2  ;;  %vm767_vm13 = vcmp.eq.s32.totalorder %v1887_v37, 3 }
   0xf   :  { %1527 = vmatpush3.msra.mxu0 %v73_v12  ;;  %1560 = vmatprep.subr.mxu1 %v1338_v31  ;;  %vm281_vm6 = vcmp.eq.s32.totalorder %v1897_v44, 1  ;;  %vm282_vm7 = vcmp.eq.s32.totalorder %v1900_v47, 1  ;;  %vm283_vm8 = vcmp.eq.s32.totalorder %v1903_v49, 1  ;;  %v1359_v59 = vld [vmem:[%s2115_s2 + $0x48] sm:$0xff]  ;;  %v1358_v60 = vld [vmem:[%s2115_s2 + $0x40] sm:$0xff]  ;;  %v1377_v61 = vld [vmem:[%s2115_s2 + $0x78] sm:$0xff] }
  0x10   :  { %1528 = vmatprep.subr.mxu0 %v72_v13  ;;  %1561 = vmatpush3.msra.mxu1 %v1338_v31  ;;  %v1347_v50 = vsel %vm281_vm6, 1.0, %v1743_v38  ;;  %v1348_v52 = vsel %vm282_vm7, 1.0, %v1743_v38  ;;  %v1349_v54 = vsel %vm283_vm8, 1.0, %v1743_v38  ;;  %v1376_v62 = vld [vmem:[%s2115_s2 + $0x70] sm:$0xff]  ;;  %v1375_v63 = vld [vmem:[%s2115_s2 + $0x68] sm:$0xff]  ;;  %v1374_v0 = vld [vmem:[%s2115_s2 + $0x60] sm:$0xff] }
  0x11   :  { %1529 = vmatpush3.msra.mxu0 %v72_v13  ;;  %v1393_v1 = vld [vmem:[%s2115_s2 + $0x98] sm:$0xff]  ;;  %v1392_v2 = vld [vmem:[%s2115_s2 + $0x90] sm:$0xff]  ;;  %v1391_v3 = vld [vmem:[%s2115_s2 + $0x88] sm:$0xff]  ;;  %v1366_v5 = vsel %vm564_vm9, 1.0, %v1743_v38  ;;  %vm565_vm10 = vcmp.eq.s32.totalorder %v1897_v44, 2  ;;  %vm566_vm11 = vcmp.eq.s32.totalorder %v1900_v47, 2 }
  0x12   :  { %1530 = vmatprep.subr.mxu0 %v71_v14  ;;  %v1390_v4 = vld [vmem:[%s2115_s2 + $0x80] sm:$0xff]  ;;  %vm567_vm12 = vcmp.eq.s32.totalorder %v1903_v49, 2  ;;  %vm768_vm14 = vcmp.eq.s32.totalorder %v1897_v44, 3  ;;  %vm769_vm15 = vcmp.eq.s32.totalorder %v1900_v47, 3  ;;  %vm973_vm5 = vcmp.eq.s32.totalorder %v1903_v49, 4 }
  0x13   :  { %1531 = vmatpush3.msra.mxu0 %v71_v14  ;;  %v1132_v45 = vld [vmem:[%s2118_s5 + $0x20] sm:$0xff]  ;;  %vm1744_vm6 = vmmov 0   ;;  %vm1109_vm8 = vcmask 392192  }
  0x14   :  { %1532 = vmatprep.subr.mxu0 %v70_v15 }
  0x15   :  { %1533 = vmatpush3.msra.mxu0 %v70_v15 }
  0x16   :  { %1534 = vmatprep.subr.mxu0 %v69_v16 }
  0x17   :  { %1535 = vmatpush3.msra.mxu0 %v69_v16 }
  0x18   :  { %1536 = vmatprep.subr.mxu0 %v68_v17 }
  0x19   :  { %1537 = vmatpush3.msra.mxu0 %v68_v17 }
  0x1a   :  { %1538 = vmatprep.subr.mxu0 %v67_v18 }
  0x1b   :  { %1539 = vmatpush3.msra.mxu0 %v67_v18 }
  0x1c   :  { %1540 = vmatprep.subr.mxu0 %v66_v19 }
  0x1d   :  { %1541 = vmatpush3.msra.mxu0 %v66_v19 }
  0x1e   :  { %1542 = vmatprep.subr.mxu0 %v65_v20 }
  0x1f   :  { %1543 = vmatpush3.msra.mxu0 %v65_v20 }
  0x20   :  { %1544 = vmatprep.subr.mxu0 %v64_v21 }
  0x21   :  { %1545 = vmatpush3.msra.mxu0 %v64_v21 }
  0x22   :  { %1546 = vmatprep.subr.mxu0 %v63_v22 }
  0x23   :  { %1547 = vmatpush3.msra.mxu0 %v63_v22 }
  0x7d   :  { %v47_v25 = vpop.permute.xlu1 %46  ;;  %v41_v26 = vpop.permute.xlu0 %40 }
  0x7e   :  { %vm51_vm0 = vcmp.eq.s32.totalorder %v38_v24, %v41_v26  ;;  %vm53_vm1 = vcmp.eq.s32.totalorder %v38_v24, %v47_v25  ;;  %v1368_v25 = vsel %vm566_vm11, 1.0, %v1743_v38  ;;  %vm1302_vm11 = vcmask 33792  }
  0x7f   :  { %1548 = vmatprep.mubr.msk.f32.mxu0 %vm51_vm0, %v1742_v27  ;;  %vm770_vm0 = vcmp.eq.s32.totalorder %v1903_v49, 3  ;;  %v1128_v49 = vld [vmem:[%s2118_s5] sm:$0xff] }
  0x81   :  { %v44_v28 = vpop.permute.xlu0 %43  ;;  %v50_v29 = vpop.permute.xlu1 %49 }
  0x82   :  { %vm52_vm2 = vcmp.eq.s32.totalorder %v38_v24, %v44_v28  ;;  %vm54_vm3 = vcmp.eq.s32.totalorder %v38_v24, %v50_v29  ;;  %v1367_v24 = vsel %vm565_vm10, 1.0, %v1743_v38  ;;  %v1369_v28 = vsel %vm567_vm12, 1.0, %v1743_v38 }
  0x83   :  { %1549 = vmatmul.mubr.msk.f32.vlgmr.msra.gmra.mxu0 %vm52_vm2, %v1742_v27  ;;  %v1382_v29 = vsel %vm767_vm13, 1.0, %v1743_v38  ;;  %vm971_vm2 = vcmp.eq.s32.totalorder %v1897_v44, 4  ;;  %v1133_v44 = vld [vmem:[%s2118_s5 + $0x28] sm:$0xff]  ;;  %vm1143_vm10 = vcmask 1041409  }
  0x84   :  { %1551 = vmatprep.mubr.msk.f32.mxu0 %vm53_vm1, %v1742_v27  ;;  %vm970_vm1 = vcmp.eq.s32.totalorder %v1887_v37, 4  ;;  %v1399_v37 = vsel %vm971_vm2, 1.0, %v1743_v38 }
  0x87   :  { %1552 = vmatmul.mubr.msk.f32.gmra.mxu0 %vm54_vm3, %v1742_v27  ;;  %vm972_vm3 = vcmp.eq.s32.totalorder %v1900_v47, 4  ;;  %v1130_v47 = vld [vmem:[%s2118_s5 + $0x10] sm:$0xff] }
  0x88   :  { %1618 = vmatprep.mubr.msk.f32.mxu0 %vm182_vm4, %v1366_v5  ;;  %v1400_v42 = vsel %vm972_vm3, 1.0, %v1743_v38 }
 0x143   :  { %v1868_v32 = vpop.f32.mrf.mxu0 }
 0x145   :  { %v1870_v33 = vpop.f32.mrf.mxu0 }
 0x146   :  { %1562 = vmatprep.mubr.msk.f32.mxu1 %vm182_vm4, %v1870_v33 }
 0x147   :  { %v1874_v34 = vpop.f32.mrf.mxu0  ;;  %1563 = vmatmul.mubr.msk.f32.vlgmr.msra.gmra.mxu1 %vm182_vm4, %v1868_v32 }
 0x149   :  { %v1878_v35 = vpop.f32.mrf.mxu0 }
 0x14a   :  { %1565 = vmatprep.mubr.msk.f32.mxu1 %vm182_vm4, %v1878_v35 }
 0x14b   :  { %1566 = vmatmul.mubr.msk.f32.gmra.mxu1 %vm182_vm4, %v1874_v34 }
 0x14c   :  { %1576 = vmatprep.mubr.msk.f32.mxu1 %vm182_vm4, %v1346_v39  ;;  %v1385_v39 = vsel %vm770_vm0, 1.0, %v1743_v38 }
 0x207   :  { %v1564_v41 = vpop.f32.mrf.mxu1 }
 0x209   :  { %v261_v43 = vpop.f32.mrf.mxu1 }
 0x20b   :  { %v1567_v46 = vpop.f32.mrf.mxu1 }
 0x20c   :  { %1568 = vmatprep.subr.mxu1 %v1567_v46 }
 0x20d   :  { %v271_v48 = vpop.f32.mrf.mxu1  ;;  %1569 = vmatpush3.msra.mxu1 %v1567_v46  ;;  %v1131_v46 = vld [vmem:[%s2118_s5 + $0x18] sm:$0xff] }
 0x20e   :  { %1570 = vmatprep.subr.mxu1 %v271_v48 }
 0x20f   :  { %1571 = vmatpush3.msra.mxu1 %v271_v48  ;;  %v1129_v48 = vld [vmem:[%s2118_s5 + $0x8] sm:$0xff] }
 0x210   :  { %1572 = vmatprep.subr.mxu1 %v1564_v41 }
 0x211   :  { %1573 = vmatpush3.msra.mxu1 %v1564_v41  ;;  %v1398_v41 = vsel %vm970_vm1, 1.0, %v1743_v38 }
 0x212   :  { %1574 = vmatprep.subr.mxu1 %v261_v43 }
 0x213   :  { %1575 = vmatpush3.msra.mxu1 %v261_v43  ;;  %v1401_v43 = vsel %vm973_vm5, 1.0, %v1743_v38 }
 0x214   :  { %1577 = vmatmul.mubr.msk.f32.vlgmr.msra.gmra.mxu1 %vm182_vm4, %v1347_v50  ;;  %1582 = vmatprep.subr.mxu1 %v176_v51 }
 0x215   :  { %1583 = vmatpush3.msra.mxu1 %v176_v51  ;;  %1579 = vmatprep.mubr.msk.f32.mxu1 %vm182_vm4, %v1348_v52 }
 0x216   :  { %1584 = vmatprep.subr.mxu1 %v175_v53 }
 0x217   :  { %1585 = vmatpush3.msra.mxu1 %v175_v53 }
 0x218   :  { %1580 = vmatmul.mubr.msk.f32.gmra.mxu1 %vm182_vm4, %v1349_v54  ;;  %1586 = vmatprep.subr.mxu1 %v174_v55 }
 0x219   :  { %1587 = vmatpush3.msra.mxu1 %v174_v55  ;;  %1590 = vmatprep.mubr.msk.f32.mxu1 %vm182_vm4, %v1870_v33 }
 0x21a   :  { %1588 = vmatprep.subr.mxu1 %v173_v56 }
 0x21b   :  { %1589 = vmatpush3.msra.mxu1 %v173_v56 }
 0x21c   :  { %1591 = vmatmul.mubr.msk.f32.vlgmr.msra.gmra.mxu1 %vm182_vm4, %v1868_v32  ;;  %1596 = vmatprep.subr.mxu1 %v1361_v57 }
 0x21d   :  { %1593 = vmatprep.mubr.msk.f32.mxu1 %vm182_vm4, %v1878_v35  ;;  %1597 = vmatpush3.msra.mxu1 %v1361_v57 }
 0x21e   :  { %1598 = vmatprep.subr.mxu1 %v1360_v58 }
 0x21f   :  { %1599 = vmatpush3.msra.mxu1 %v1360_v58 }
 0x220   :  { %1594 = vmatmul.mubr.msk.f32.gmra.mxu1 %vm182_vm4, %v1874_v34  ;;  %1600 = vmatprep.subr.mxu1 %v1359_v59 }
 0x221   :  { %1601 = vmatpush3.msra.mxu1 %v1359_v59  ;;  %1604 = vmatprep.mubr.msk.f32.mxu1 %vm182_vm4, %v1870_v33 }
 0x222   :  { %1602 = vmatprep.subr.mxu1 %v1358_v60 }
 0x223   :  { %1603 = vmatpush3.msra.mxu1 %v1358_v60 }
 0x224   :  { %1605 = vmatmul.mubr.msk.f32.vlgmr.msra.gmra.mxu1 %vm182_vm4, %v1868_v32  ;;  %1624 = vmatprep.subr.mxu1 %v1377_v61 }
 0x225   :  { %1607 = vmatprep.mubr.msk.f32.mxu1 %vm182_vm4, %v1878_v35  ;;  %1625 = vmatpush3.msra.mxu1 %v1377_v61 }
 0x226   :  { %1626 = vmatprep.subr.mxu1 %v1376_v62 }
 0x227   :  { %1627 = vmatpush3.msra.mxu1 %v1376_v62  ;;  %v1406_v62 = vld [vmem:[%s2116_s3] ss:$0 sm:$0xff] }
 0x228   :  { %1608 = vmatmul.mubr.msk.f32.gmra.mxu1 %vm182_vm4, %v1874_v34  ;;  %1628 = vmatprep.subr.mxu1 %v1375_v63 }
 0x229   :  { %1629 = vmatpush3.msra.mxu1 %v1375_v63  ;;  %1632 = vmatprep.mubr.msk.f32.mxu1 %vm182_vm4, %v1870_v33 }
 0x22a   :  { %1630 = vmatprep.subr.mxu1 %v1374_v0 }
 0x22b   :  { %1631 = vmatpush3.msra.mxu1 %v1374_v0 }
 0x22c   :  { %1633 = vmatmul.mubr.msk.f32.vlgmr.msra.gmra.mxu1 %vm182_vm4, %v1868_v32  ;;  %1652 = vmatprep.subr.mxu1 %v1393_v1 }
 0x22d   :  { %1635 = vmatprep.mubr.msk.f32.mxu1 %vm182_vm4, %v1878_v35  ;;  %1653 = vmatpush3.msra.mxu1 %v1393_v1 }
 0x22e   :  { %1654 = vmatprep.subr.mxu1 %v1392_v2 }
 0x22f   :  { %1655 = vmatpush3.msra.mxu1 %v1392_v2  ;;  %v1407_v2 = vld [vmem:[%s2117_s4] ss:$0 sm:$0xff] }
 0x230   :  { %1636 = vmatmul.mubr.msk.f32.gmra.mxu1 %vm182_vm4, %v1874_v34  ;;  %1656 = vmatprep.subr.mxu1 %v1391_v3  ;;  %vm1104_vm7 = vcmp.lt.s32.totalorder %v1893_v40, %v1407_v2  ;;  %vm1103_vm9 = vcmp.lt.s32.totalorder %v1884_v36, %v1407_v2 }
 0x231   :  { %1657 = vmatpush3.msra.mxu1 %v1391_v3  ;;  %1660 = vmatprep.mubr.msk.f32.mxu1 %vm182_vm4, %v1870_v33  ;;  %v1384_v33 = vsel %vm769_vm15, 1.0, %v1743_v38 }
 0x232   :  { %1658 = vmatprep.subr.mxu1 %v1390_v4 }
 0x233   :  { %1659 = vmatpush3.msra.mxu1 %v1390_v4 }
 0x234   :  { %1661 = vmatmul.mubr.msk.f32.vlgmr.msra.gmra.mxu1 %vm182_vm4, %v1868_v32  ;;  %1680 = vmatprep.subr.mxu1 %v1743_v38  ;;  %v1383_v32 = vsel %vm768_vm14, 1.0, %v1743_v38 }
 0x235   :  { %1663 = vmatprep.mubr.msk.f32.mxu1 %vm182_vm4, %v1878_v35  ;;  %1681 = vmatpush3.msra.mxu1 %v1133_v44  ;;  %v1221_v44 = vld [vmem:[%s2120_s7 + $0x18] sm:$0xff] }
 0x236   :  { %1682 = vmatprep.subr.mxu1 %v1743_v38 }
 0x237   :  { %1683 = vmatpush3.msra.mxu1 %v1132_v45  ;;  %v1220_v45 = vld [vmem:[%s2120_s7 + $0x10] sm:$0xff] }
 0x238   :  { %1664 = vmatmul.mubr.msk.f32.gmra.mxu1 %vm182_vm4, %v1874_v34  ;;  %1684 = vmatprep.subr.mxu1 %v1743_v38 }
 0x239   :  { %1685 = vmatpush3.msra.mxu1 %v1131_v46  ;;  %1692 = vmatprep.mubr.msk.f32.mxu1 %vm1744_vm6, %v1743_v38  ;;  %v1219_v46 = vld [vmem:[%s2120_s7 + $0x8] sm:$0xff] }
 0x23a   :  { %1686 = vmatprep.subr.mxu1 %v1743_v38 }
 0x23b   :  { %1687 = vmatpush3.msra.mxu1 %v1130_v47  ;;  %v1218_v47 = vld [vmem:[%s2120_s7] sm:$0xff] }
 0x23c   :  { %1688 = vmatprep.subr.mxu1 %v1743_v38 }
 0x23d   :  { %1689 = vmatpush3.msra.mxu1 %v1129_v48  ;;  %v1408_v48 = vld [vmem:[%s2119_s6] ss:$0 sm:$0xff]  ;;  %s1745_s6 = smov [#allocation2]  }
 0x23e   :  { %1690 = vmatprep.subr.mxu1 %v1743_v38  ;;  %s1322_s7 = sshll.u32 %s1745_s6, 4  ;;  %s1323_s7 = int_to_ptr.vmem [resolvable:$true] %s1322_s7 }
 0x23f   :  { %1691 = vmatpush3.msra.mxu1 %v1128_v49  ;;  %p1724_p1 = scmp.lt.s32.totalorder %s1323_s7, %s1323_s7 }
 0x2d4   :  { %v1578_v6 = vpop.f32.mrf.mxu1 }
 0x2d6   :  { %v370_v7 = vpop.f32.mrf.mxu1 }
 0x2d8   :  { %v1581_v8 = vpop.f32.mrf.mxu1 }
 0x2da   :  { %v380_v9 = vpop.f32.mrf.mxu1 }
 0x2dc   :  { %v1592_v10 = vpop.f32.mrf.mxu1 }
 0x2dd   :  { %v1997_v11 = vadd.f32 %v1592_v10, %v1578_v6 }
 0x2de   :  { %v455_v12 = vpop.f32.mrf.mxu1 }
 0x2df   :  { %v1999_v13 = vadd.f32 %v455_v12, %v370_v7 }
 0x2e0   :  { %v1595_v14 = vpop.f32.mrf.mxu1 }
 0x2e1   :  { %v2001_v15 = vadd.f32 %v1595_v14, %v1581_v8 }
 0x2e2   :  { %v465_v16 = vpop.f32.mrf.mxu1 }
 0x2e3   :  { %v2003_v17 = vadd.f32 %v465_v16, %v380_v9 }
 0x2e4   :  { %v1606_v18 = vpop.f32.mrf.mxu1 }
 0x2e6   :  { %v545_v19 = vpop.f32.mrf.mxu1 }
 0x2e8   :  { %v1609_v20 = vpop.f32.mrf.mxu1 }
 0x2e9   :  { %1610 = vmatprep.subr.mxu0 %v1609_v20 }
 0x2ea   :  { %v555_v21 = vpop.f32.mrf.mxu1  ;;  %1611 = vmatpush3.msra.mxu0 %v1609_v20 }
 0x2eb   :  { %1612 = vmatprep.subr.mxu0 %v555_v21 }
 0x2ec   :  { %1613 = vmatpush3.msra.mxu0 %v555_v21  ;;  %v1634_v22 = vpop.f32.mrf.mxu1 }
 0x2ed   :  { %1614 = vmatprep.subr.mxu0 %v1606_v18 }
 0x2ee   :  { %1615 = vmatpush3.msra.mxu0 %v1606_v18  ;;  %v748_v23 = vpop.f32.mrf.mxu1 }
 0x2ef   :  { %1616 = vmatprep.subr.mxu0 %v545_v19 }
 0x2f0   :  { %1617 = vmatpush3.msra.mxu0 %v545_v19  ;;  %v1637_v26 = vpop.f32.mrf.mxu1 }
 0x2f1   :  { %1619 = vmatmul.mubr.msk.f32.vlgmr.msra.gmra.mxu0 %vm182_vm4, %v1367_v24  ;;  %1638 = vmatprep.subr.mxu0 %v1637_v26 }
 0x2f2   :  { %v758_v27 = vpop.f32.mrf.mxu1  ;;  %1639 = vmatpush3.msra.mxu0 %v1637_v26  ;;  %1621 = vmatprep.mubr.msk.f32.mxu0 %vm182_vm4, %v1368_v25 }
 0x2f3   :  { %1640 = vmatprep.subr.mxu0 %v758_v27 }
 0x2f4   :  { %1641 = vmatpush3.msra.mxu0 %v758_v27  ;;  %v1662_v30 = vpop.f32.mrf.mxu1 }
 0x2f5   :  { %1622 = vmatmul.mubr.msk.f32.gmra.mxu0 %vm182_vm4, %v1369_v28  ;;  %1642 = vmatprep.subr.mxu0 %v1634_v22 }
 0x2f6   :  { %1643 = vmatpush3.msra.mxu0 %v1634_v22  ;;  %v951_v31 = vpop.f32.mrf.mxu1  ;;  %1646 = vmatprep.mubr.msk.f32.mxu0 %vm182_vm4, %v1382_v29 }
 0x2f7   :  { %1644 = vmatprep.subr.mxu0 %v748_v23 }
 0x2f8   :  { %1645 = vmatpush3.msra.mxu0 %v748_v23  ;;  %v1665_v34 = vpop.f32.mrf.mxu1 }
 0x2f9   :  { %1647 = vmatmul.mubr.msk.f32.vlgmr.msra.gmra.mxu0 %vm182_vm4, %v1383_v32  ;;  %1666 = vmatprep.subr.mxu0 %v1665_v34 }
 0x2fa   :  { %v961_v35 = vpop.f32.mrf.mxu1  ;;  %1667 = vmatpush3.msra.mxu0 %v1665_v34  ;;  %1649 = vmatprep.mubr.msk.f32.mxu0 %vm182_vm4, %v1384_v33 }
 0x2fb   :  { %1668 = vmatprep.subr.mxu0 %v961_v35 }
 0x2fc   :  { %1669 = vmatpush3.msra.mxu0 %v961_v35 }
 0x2fd   :  { %1650 = vmatmul.mubr.msk.f32.gmra.mxu0 %vm182_vm4, %v1385_v39  ;;  %1670 = vmatprep.subr.mxu0 %v1662_v30 }
 0x2fe   :  { %1671 = vmatpush3.msra.mxu0 %v1662_v30  ;;  %1674 = vmatprep.mubr.msk.f32.mxu0 %vm182_vm4, %v1398_v41 }
 0x2ff   :  { %1672 = vmatprep.subr.mxu0 %v951_v31 }
 0x300   :  { %1673 = vmatpush3.msra.mxu0 %v951_v31 }
 0x301   :  { %1675 = vmatmul.mubr.msk.f32.vlgmr.msra.gmra.mxu0 %vm182_vm4, %v1399_v37  ;;  %1695 = vmatprep.subr.mxu0 %v1743_v38 }
 0x302   :  { %1677 = vmatprep.mubr.msk.f32.mxu0 %vm182_vm4, %v1400_v42  ;;  %1696 = vmatpush3.msra.mxu0 %v1221_v44 }
 0x303   :  { %1697 = vmatprep.subr.mxu0 %v1743_v38 }
 0x304   :  { %1698 = vmatpush3.msra.mxu0 %v1220_v45 }
 0x305   :  { %1678 = vmatmul.mubr.msk.f32.gmra.mxu0 %vm182_vm4, %v1401_v43  ;;  %1699 = vmatprep.subr.mxu0 %v1743_v38 }
 0x306   :  { %1703 = vmatprep.mubr.msk.f32.mxu0 %vm1744_vm6, %v1743_v38  ;;  %1700 = vmatpush3.msra.mxu0 %v1219_v46 }
 0x307   :  { %1701 = vmatprep.subr.mxu0 %v1743_v38 }
 0x308   :  { %1702 = vmatpush3.msra.mxu0 %v1218_v47 }
 0x3b1   :  { %v1620_v50 = vpop.f32.mrf.mxu0 }
 0x3b2   :  { %v674_v57 = vadd.f32 %v1620_v50, %v1997_v11 }
 0x3b3   :  { %v654_v51 = vpop.f32.mrf.mxu0 }
 0x3b4   :  { %v673_v59 = vadd.f32 %v654_v51, %v1999_v13 }
 0x3b5   :  { %v1623_v52 = vpop.f32.mrf.mxu0 }
 0x3b6   :  { %v676_v63 = vadd.f32 %v1623_v52, %v2001_v15 }
 0x3b7   :  { %v664_v53 = vpop.f32.mrf.mxu0 }
 0x3b8   :  { %v675_v4 = vadd.f32 %v664_v53, %v2003_v17  ;;  %v1410_v53 = vld [vmem:[%s2121_s8] ss:$0 sm:$0xff]  ;;  %s1719_s8 = scalar_lea.vmem %s1323_s7, 32 }
 0x3b9   :  { %v1648_v54 = vpop.f32.mrf.mxu0  ;;  %p1720_p0 = scmp.ne.s32.totalorder %s1323_s7, %s1719_s8  ;;  %p1725_p2 = scmp.lt.s32.totalorder %s1719_s8, %s1719_s8 }
 0x3ba   :  { %v877_v60 = vadd.f32 %v1648_v54, %v674_v57 }
 0x3bb   :  { %v857_v55 = vpop.f32.mrf.mxu0  ;;  %p1726_p3 = por %p1725_p2, %p1724_p1 }
 0x3bc   :  { %v876_v0 = vadd.f32 %v857_v55, %v673_v59 }
 0x3bd   :  { %v1651_v56 = vpop.f32.mrf.mxu0  ;;  %p1727_p4 = pnand %p1726_p3, %p1720_p0 }
 0x3be   :  { %v879_v5 = vadd.f32 %v1651_v56, %v676_v63 }
 0x3bf   :  { %v867_v58 = vpop.f32.mrf.mxu0 }
 0x3c0   :  { %v878_v9 = vadd.f32 %v867_v58, %v675_v4 }
 0x3c1   :  { %v1676_v61 = vpop.f32.mrf.mxu0 }
 0x3c2   :  { %v1080_v1 = vadd.f32 %v1676_v61, %v877_v60 }
 0x3c3   :  { %v1060_v3 = vpop.f32.mrf.mxu0 }
 0x3c4   :  { %v1091_v6 = vadd.f32 %v1406_v62, %v1080_v1  ;;  %v1079_v7 = vadd.f32 %v1060_v3, %v876_v0 }
 0x3c5   :  { %v1679_v8 = vpop.f32.mrf.mxu0 }
 0x3c6   :  { %v1095_v10 = vmax.f32 %v1091_v6, 0.0  ;;  %v1090_v11 = vadd.f32 %v1406_v62, %v1079_v7  ;;  %v1082_v12 = vadd.f32 %v1679_v8, %v879_v5 }
 0x3c7   :  { %v1070_v13 = vpop.f32.mrf.mxu0 }
 0x3c8   :  { %v1106_v14 = vsel %vm1104_vm7, %v1095_v10, 0.0  ;;  %v1094_v15 = vmax.f32 %v1090_v11, 0.0  ;;  %v1093_v16 = vadd.f32 %v1406_v62, %v1082_v12  ;;  %v1081_v17 = vadd.f32 %v1070_v13, %v878_v9 }
 0x3c9   :  { %v1111_v21 = vsel %vm1109_vm8, %v1106_v14, -inf }
 0x3ca   :  { %v1105_v18 = vsel %vm1103_vm9, %v1094_v15, 0.0  ;;  %v1097_v19 = vmax.f32 %v1093_v16, 0.0  ;;  %v1092_v20 = vadd.f32 %v1406_v62, %v1081_v17 }
 0x3cb   :  { %v1110_v22 = vsel %vm1109_vm8, %v1105_v18, -inf }
 0x3cc   :  { %v1112_v23 = vmax.f32 %v1110_v22, %v1111_v21  ;;  %v1108_v24 = vsel %vm1104_vm7, %v1097_v19, 0.0  ;;  %v1096_v25 = vmax.f32 %v1092_v20, 0.0 }
 0x3cd   :  { %v1120_v27 = vsel %vm1109_vm8, %v1108_v24, -inf }
 0x3ce   :  { %v1113_v36 = vrot.slane %v1112_v23, 4  ;;  %v1107_v26 = vsel %vm1103_vm9, %v1096_v25, 0.0 }
 0x3cf   :  { %v1119_v28 = vsel %vm1109_vm8, %v1107_v26, -inf }
 0x3d0   :  { %v1114_v29 = vmax.f32 %v1112_v23, %v1113_v36  ;;  %v1121_v30 = vmax.f32 %v1119_v28, %v1120_v27 }
 0x3d2   :  { %v1115_v31 = vrot.slane %v1114_v29, 2  ;;  %v1122_v32 = vrot.slane %v1121_v30, 4 }
 0x3d4   :  { %v1116_v33 = vmax.f32 %v1114_v29, %v1115_v31  ;;  %v1123_v34 = vmax.f32 %v1121_v30, %v1122_v32 }
 0x3d6   :  { %v1124_v35 = vrot.slane %v1123_v34, 2  ;;  %v1117_v39 = vrot.slane %v1116_v33, 1 }
 0x3d8   :  { %v1125_v41 = vmax.f32 %v1123_v34, %v1124_v35  ;;  %v1118_v40 = vmax.f32 %v1116_v33, %v1117_v39 }
 0x3da   :  { %v1126_v37 = vrot.slane %v1125_v41, 1 }
 0x3dc   :  { %v1127_v42 = vmax.f32 %v1125_v41, %v1126_v37 }
 0x3de   :  { %v1144_v43 = vsel %vm1143_vm10, %v1127_v42, %v1118_v40 }
 0x3df   :  { %1693 = vmatmul.mubr.msk.f32.vlgmr.msra.gmra.mxu1 %vm1109_vm8, %v1144_v43 }
 0x49f   :  { %v1213_v49 = vpop.f32.mrf.mxu1 }
 0x4a0   :  { %v1214_v50 = vadd.f32 %v1408_v48, %v1213_v49 }
 0x4a1   :  { %v1694_v51 = vpop.f32.mrf.mxu1 }
 0x4a2   :  { %1713 = vtanh.f32 %v1214_v50 }
 0x4af   :  { %v1714_v52 = vpop.eup %1713 }
 0x4b0   :  { %1704 = vmatmul.mubr.msk.f32.vlgmr.msra.gmra.mxu0 %vm182_vm4, %v1714_v52 }
 0x570   :  { %v1298_v54 = vpop.f32.mrf.mxu0 }
 0x571   :  { %v1299_v55 = vadd.f32 %v1410_v53, %v1298_v54 }
 0x572   :  { %v1705_v38 = vpop.f32.mrf.mxu0 }
 0x573   :  { %v1303_v56 = vsel %vm1302_vm11, %v1299_v55, -inf }
 0x574   :  { %1304 = vmax.xlane.f32.xlu0 %v1303_v56 }
 0x5fd   :  { %v1305_v57 = vpop.xlane.xlu0 %1304 }
 0x5fe   :  { %v1306_v58 = vsub.f32 %v1299_v55, %v1305_v57 }
 0x600   :  { %v1307_v59 = vmul.f32 1.442695, %v1306_v58 }
 0x602   :  { %1715 = vpow2.f32 %v1307_v59 }
 0x60f   :  { %v1716_v60 = vpop.eup %1715 }
 0x610   :  { %v1309_v61 = vsel %vm1302_vm11, %v1716_v60, 0.0 }
 0x611   :  { %1310 = vadd.xlane.f32.xlu1 %v1309_v61 }
 0x69a   :  { %v1311_v62 = vpop.xlane.xlu1 %1310 }
 0x69b   :  { %1717 = vlog2.f32 %v1311_v62 }
 0x6a8   :  { %v1718_v63 = vpop.eup %1717 }
 0x6a9   :  { %v1313_v0 = vmul.f32 0.6931472, %v1718_v63 }
 0x6ab   :  { %v1314_v1 = vsub.f32 %v1306_v58, %v1313_v0 }
 0x6ad   :  { %1315 = vst.msk [vmem:[#allocation2] sm:$0x3] %vm1302_vm11, %v1314_v1 }
 0x6ae   :  { %1730 = shalt.err (!%p1727_p4)
}
 0x6af   :  { %1325 = dma.vmem_to_hbm [thread:$0]  %s1323_s7, 32, %s2122_s9, [#allocation3]  }
 0x6b0   :  { %1739 = dma.done.wait [#allocation3], 32  }
 0x6b1   :  { %1740 = vsyncadd [#allocation3], 4294967264 }
 0x6b2   :  { %1329 = vsyncpa [#allocation3], 1 }

</bundles_post_ra>
